<compile_context>
chip_gen: v7x
topology: tpu7x:2x2x1
jax: 0.10.0
libtpu: 0.0.40
codegen_flags: <defaults>
</compile_context>

<pallas_src>
import functools
import math

import jax
import jax.numpy as jnp
from jax.experimental import pallas as pl
from jax.experimental.pallas import tpu as pltpu


def _fs(shape):
    """Full-array BlockSpec for a 2-D array under a trivial grid=(1,)."""
    return pl.BlockSpec(shape, lambda i: (0, 0))


def _mosaic_params(est_vmem_bytes):
    """CompilerParams with a working-set-sized VMEM limit (valid on v5e/v6e/v7x)."""
    vmem = max(32 << 20, min(64 << 20, int(est_vmem_bytes)))
    return pltpu.CompilerParams(
        dimension_semantics=("arbitrary",),
        vmem_limit_bytes=vmem,
    )


def _lane_pad(width):
    return ((width + 127) // 128) * 128


# --------------- fused kernel 1: GCN1 -> GCN2 -> ASAP scoring -----------------
def _encoder_pool_kernel(a_norm_ref, a_hat_ref, deg_ref, x0_ref,
                         w1_ref, b1_ref, w2_ref, b2_ref,
                         w_att_ref, w123_ref, b_le_ref,
                         st_ref, xcfit_ref):
    f32 = jnp.float32
    a_norm = a_norm_ref[...]                       # [N,N]
    a_hat = a_hat_ref[...]                         # [N,N] (self loops included)
    h = w_att_ref.shape[1]
    n = a_norm.shape[0]

    # --- GCN1: tanh(A_norm @ (X @ W1) + b1) --- (X@W first is the cheap association)
    xw = jnp.dot(x0_ref[...], w1_ref[...], preferred_element_type=f32)
    x = jnp.tanh(jnp.dot(a_norm, xw, preferred_element_type=f32) + b1_ref[...])

    # --- GCN2 ---
    xw = jnp.dot(x, w2_ref[...], preferred_element_type=f32)
    x = jnp.tanh(jnp.dot(a_norm, xw, preferred_element_type=f32) + b2_ref[...])

    # --- bilinear ego-net attention, computed in transposed (cluster-major) form ---
    # TODO(synk): true ASAP uses h-hop ego-net attention with a max-pooled master
    # query + LEConv on node feats; here it is 1-hop bilinear attention + dense
    # LEConv on cluster reps.
    q = jnp.dot(x, w_att_ref[...], preferred_element_type=f32)              # [N,H]
    # e[j,i] = <x_j, q_i>  (logit of node i for the cluster centered at j)
    e = jax.lax.dot_general(x, q, (((1,), (1,)), ((), ())),
                            preferred_element_type=f32)                    # [N,N]
    e = jnp.where(e > 0, e, 0.2 * e)                                        # leaky relu

    member = a_hat > 0                     # node i in the 1-hop egonet of cluster j
    e = jnp.where(member, e, -1e30)
    e = e - jnp.max(e, axis=1, keepdims=True)
    # NOTE: non-members underflow to exactly 0 here (rely on -1e30 mask + row-max
    # subtraction); the explicit second mask was redundant and is dropped.
    p = jnp.exp(e)
    st = p / (jnp.sum(p, axis=1, keepdims=True) + 1e-16)  # row softmax -> S^T[j,i]
    st_ref[...] = st

    # --- cluster representations: xc[j] = sum_i S^T[j,i] x[i] ---
    xc = jnp.dot(st, x, preferred_element_type=f32)                         # [N,H]

    # --- LEConv fitness: sigmoid(xc W1 + deg*(xc W2) - A_hat (xc W3) + b) ---
    # w1|w2|w3 fused into one [H,3] matmul.
    hw = jnp.dot(xc, w123_ref[...], preferred_element_type=f32)             # [N,3]
    fit = jax.nn.sigmoid(
        hw[:, 0:1]
        + deg_ref[...] * hw[:, 1:2]
        - jnp.dot(a_hat, hw[:, 2:3], preferred_element_type=f32)
        + b_le_ref[...])

    # merged, lane-dense output slab: lanes [0:H] = cluster reps, lane H = fitness,
    # remaining lanes are zero padding -> one full (unmasked) store.
    pad = xcfit_ref.shape[1]
    slab = jnp.concatenate([xc, fit, jnp.zeros((n, pad - h - 1), f32)], axis=1)
    xcfit_ref[...] = slab


def encoder_pool(a_norm, a_hat, deg, x0, w1, b1, w2, b2, w_att, w123, b_le):
    n, f = x0.shape
    h = w1.shape[1]
    pad = _lane_pad(h + 1)
    # rough live working set: a_norm/a_hat in, st/xcfit out (double buffered),
    # e/p/member f32 temporaries, plus feature-sized arrays.
    est = 4 * (12 * n * n + 8 * n * (pad + h + f)) + (2 << 20)
    return pl.pallas_call(
        _encoder_pool_kernel,
        grid=(1,),
        in_specs=[_fs((n, n)), _fs((n, n)), _fs((n, 1)), _fs((n, f)),
                  _fs((f, h)), _fs((1, h)), _fs((h, h)), _fs((1, h)),
                  _fs((h, h)), _fs((h, 3)), _fs((1, 1))],
        out_specs=(_fs((n, n)), _fs((n, pad))),
        out_shape=(jax.ShapeDtypeStruct((n, n), jnp.float32),      # S^T
                   jax.ShapeDtypeStruct((n, pad), jnp.float32)),   # [xc | fit | 0pad]
        compiler_params=_mosaic_params(est),
    )(a_norm, a_hat, deg, x0, w1, b1, w2, b2, w_att, w123, b_le)


# ------- fused kernel 2: coarsen + decoder bmm -> GCN3 -> GCN4 -> GCN5 --------
def _decoder_kernel(a_norm_ref, a_hat_ref, st_ref, xcfit_ref,
                    w3_ref, b3_ref, w4_ref, b4_ref, w5_ref, b5_ref,
                    x_ref, adj_ref):
    f32 = jnp.float32
    a_norm = a_norm_ref[...]                       # [N,N]
    a_hat = a_hat_ref[...]                         # [N,N]
    st = st_ref[...]                               # [k,N] selected S^T rows
    h = w3_ref.shape[0]

    xcfit = xcfit_ref[...]                                   # [k, pad]
    x_pool = xcfit[:, 0:h] * xcfit[:, h:h + 1]               # fitness-gated feats [k,H]

    # "transposed" contractions expressed via dot_general (no host-side s = st.T):
    contract_last_last = (((1,), (1,)), ((), ()))    # a[n,i] . b[k,i]  -> [n,k]
    contract_first_first = (((0,), (0,)), ((), ()))  # a[k,n] . b[k,m]  -> [n,m]

    # coarsened adjacency: adj_pool = S^T A_hat S
    a_s = jax.lax.dot_general(a_hat, st, contract_last_last,
                              preferred_element_type=f32)                   # [N,k]
    adj_pool = jnp.dot(st, a_s, preferred_element_type=f32)                 # [k,k]

    # decoder (torch.bmm path): x_out = S x_pool ; adj_out = S adj_pool S^T
    x_out = jax.lax.dot_general(st, x_pool, contract_first_first,
                                preferred_element_type=f32)                 # [N,H]
    t = jax.lax.dot_general(st, adj_pool, contract_first_first,
                            preferred_element_type=f32)                     # [N,k]
    adj_ref[...] = jnp.dot(t, st, preferred_element_type=f32)               # [N,N]

    # --- GCN3 ---
    xw = jnp.dot(x_out, w3_ref[...], preferred_element_type=f32)
    x = jnp.tanh(jnp.dot(a_norm, xw, preferred_element_type=f32) + b3_ref[...])
    # --- GCN4 ---
    xw = jnp.dot(x, w4_ref[...], preferred_element_type=f32)
    x = jnp.tanh(jnp.dot(a_norm, xw, preferred_element_type=f32) + b4_ref[...])
    # --- GCN5 (no activation) ---
    xw = jnp.dot(x, w5_ref[...], preferred_element_type=f32)
    x_ref[...] = jnp.dot(a_norm, xw, preferred_element_type=f32) + b5_ref[...]


def decode(a_norm, a_hat, st_sel, xcfit_sel, w3, b3, w4, b4, w5, b5):
    n = a_norm.shape[0]
    k, pad = xcfit_sel.shape
    h = w3.shape[0]
    f = w5.shape[1]
    est = 4 * (10 * n * n + 8 * n * (h + f + k) + 2 * k * (n + pad)) + (2 << 20)
    return pl.pallas_call(
        _decoder_kernel,
        grid=(1,),
        in_specs=[_fs((n, n)), _fs((n, n)), _fs((k, n)), _fs((k, pad)),
                  _fs((h, h)), _fs((1, h)), _fs((h, h)), _fs((1, h)),
                  _fs((h, f)), _fs((1, f))],
        out_specs=(_fs((n, f)), _fs((n, n))),
        out_shape=(jax.ShapeDtypeStruct((n, f), jnp.float32),
                   jax.ShapeDtypeStruct((n, n), jnp.float32)),
        compiler_params=_mosaic_params(est),
    )(a_norm, a_hat, st_sel, xcfit_sel, w3, b3, w4, b4, w5, b5)


# ----------------------------------- glue -------------------------------------
def glorot(key, shape):
    fan_in, fan_out = shape
    lim = math.sqrt(6.0 / (fan_in + fan_out))
    return jax.random.uniform(key, shape, jnp.float32, -lim, lim)


def init_params(key, num_features, nhid):
    ks = jax.random.split(key, 9)
    return {
        "conv1_w": glorot(ks[0], (num_features, nhid)), "conv1_b": jnp.zeros((nhid,), jnp.float32),
        "conv2_w": glorot(ks[1], (nhid, nhid)),         "conv2_b": jnp.zeros((nhid,), jnp.float32),
        "conv3_w": glorot(ks[2], (nhid, nhid)),         "conv3_b": jnp.zeros((nhid,), jnp.float32),
        "conv4_w": glorot(ks[3], (nhid, nhid)),         "conv4_b": jnp.zeros((nhid,), jnp.float32),
        "conv5_w": glorot(ks[4], (nhid, num_features)), "conv5_b": jnp.zeros((num_features,), jnp.float32),
        "pool": {
            "w_att": glorot(ks[5], (nhid, nhid)),
            "w1": glorot(ks[6], (nhid, 1)),
            "w2": glorot(ks[7], (nhid, 1)),
            "w3": glorot(ks[8], (nhid, 1)),
            "b_le": jnp.zeros((1, 1), jnp.float32),
        },
    }


def dense_graph(edge_index, n):
    a = jnp.zeros((n, n), jnp.float32).at[edge_index[0], edge_index[1]].set(1.0)
    a_hat = jnp.maximum(a, jnp.eye(n, dtype=jnp.float32))     # add self loops
    deg = jnp.sum(a_hat, axis=1)
    d_inv_sqrt = 1.0 / jnp.sqrt(jnp.maximum(deg, 1e-12))
    a_norm = a_hat * d_inv_sqrt[:, None] * d_inv_sqrt[None, :]
    return a_hat, a_norm, deg


@functools.partial(jax.jit, static_argnames=("ratio",))
def asap_ae_forward(params, nodes, edge_index, batch, *, ratio=0.5):
    del batch  # single-graph batch (all zeros): to_dense_batch is an identity reshape here
    n, f = nodes.shape
    h = params["conv1_w"].shape[1]
    a_hat, a_norm, deg = dense_graph(edge_index, n)

    pool = params["pool"]
    w123 = jnp.concatenate([pool["w1"], pool["w2"], pool["w3"]], axis=1)   # [H,3]

    # fused encoder GCNs + ASAP scoring (assignment kept transposed: S^T)
    st_full, xcfit = encoder_pool(
        a_norm, a_hat, deg.reshape(n, 1), nodes,
        params["conv1_w"], params["conv1_b"].reshape(1, h),
        params["conv2_w"], params["conv2_b"].reshape(1, h),
        pool["w_att"], w123, pool["b_le"])

    fitness = xcfit[:, h]                                  # [N]
    k = int(math.ceil(ratio * n))
    # TODO(synk): top-k cluster selection + gather are data dependent -> plain JAX, not Pallas.
    _, perm = jax.lax.top_k(fitness, k)
    st_sel = jnp.take(st_full, perm, axis=0)               # [k, N]   (S^T, selected rows)
    xcfit_sel = jnp.take(xcfit, perm, axis=0)              # [k, pad] ([xc | fit | 0])

    # fused coarsen + decoder bmm's + decoder GCNs
    # recon_adj = False -> decode on the original graph structure
    # TODO(synk): dense_to_sparse(adj_out) edge extraction (recon_adj=True) is data dependent.
    x_recon, adj_out = decode(
        a_norm, a_hat, st_sel, xcfit_sel,
        params["conv3_w"], params["conv3_b"].reshape(1, h),
        params["conv4_w"], params["conv4_b"].reshape(1, h),
        params["conv5_w"], params["conv5_b"].reshape(1, f))

    return x_recon, adj_out[None, :, :], 0, 0


if __name__ == "__main__":
    N, F, H = 16, 4, 8
    key = jax.random.PRNGKey(0)
    k_feat, k_par = jax.random.split(key)

    nodes = jax.random.normal(k_feat, (N, F), jnp.float32)
    # deterministic ring + chord graph, E = 4 * N = 64 directed edges
    src, dst = [], []
    for i in range(N):
        for d in (1, 2):
            j = (i + d) % N
            src += [i, j]
            dst += [j, i]
    edge_index = jnp.array([src, dst], dtype=jnp.int32)
    batch = jnp.zeros((N,), jnp.int32)

    params = init_params(k_par, F, H)
    x_recon, adj_out, _, _ = asap_ae_forward(params, nodes, edge_index, batch, ratio=0.5)
    jax.block_until_ready((x_recon, adj_out))
    assert x_recon.shape == (N, F) and adj_out.shape == (1, N, N)
    assert bool(jnp.all(jnp.isfinite(x_recon))) and bool(jnp.all(jnp.isfinite(adj_out)))
    print("KERNEL_OK")
</pallas_src>

<mosaic_0001>
module attributes {stable_mosaic.version = 11 : i64} {
  func.func @_encoder_pool_kernel(%arg0: i32, %arg1: memref<16x16xf32, #tpu.memory_space<vmem>>, %arg2: memref<16x16xf32, #tpu.memory_space<vmem>>, %arg3: memref<16x1xf32, #tpu.memory_space<vmem>>, %arg4: memref<16x4xf32, #tpu.memory_space<vmem>>, %arg5: memref<4x8xf32, #tpu.memory_space<vmem>>, %arg6: memref<1x8xf32, #tpu.memory_space<vmem>>, %arg7: memref<8x8xf32, #tpu.memory_space<vmem>>, %arg8: memref<1x8xf32, #tpu.memory_space<vmem>>, %arg9: memref<8x8xf32, #tpu.memory_space<vmem>>, %arg10: memref<8x3xf32, #tpu.memory_space<vmem>>, %arg11: memref<1x1xf32, #tpu.memory_space<vmem>>, %arg12: memref<16x16xf32, #tpu.memory_space<vmem>>, %arg13: memref<16x128xf32, #tpu.memory_space<vmem>>) attributes {dimension_semantics = [#tpu.dimension_semantics<arbitrary>], iteration_bounds = array<i64: 1>, scalar_prefetch = 0 : i64, scratch_operands = 0 : i64, tpu.core_type = #tpu.core_type<tc>, window_params = [{pipeline_mode = #tpu.pipeline_mode<synchronous>, transform_indices = @transform_0, window_bounds = array<i64: 16, 16>}, {pipeline_mode = #tpu.pipeline_mode<synchronous>, transform_indices = @transform_1, window_bounds = array<i64: 16, 16>}, {pipeline_mode = #tpu.pipeline_mode<synchronous>, transform_indices = @transform_2, window_bounds = array<i64: 16, 1>}, {pipeline_mode = #tpu.pipeline_mode<synchronous>, transform_indices = @transform_3, window_bounds = array<i64: 16, 4>}, {pipeline_mode = #tpu.pipeline_mode<synchronous>, transform_indices = @transform_4, window_bounds = array<i64: 4, 8>}, {pipeline_mode = #tpu.pipeline_mode<synchronous>, transform_indices = @transform_5, window_bounds = array<i64: 1, 8>}, {pipeline_mode = #tpu.pipeline_mode<synchronous>, transform_indices = @transform_6, window_bounds = array<i64: 8, 8>}, {pipeline_mode = #tpu.pipeline_mode<synchronous>, transform_indices = @transform_7, window_bounds = array<i64: 1, 8>}, {pipeline_mode = #tpu.pipeline_mode<synchronous>, transform_indices = @transform_8, window_bounds = array<i64: 8, 8>}, {pipeline_mode = #tpu.pipeline_mode<synchronous>, transform_indices = @transform_9, window_bounds = array<i64: 8, 3>}, {pipeline_mode = #tpu.pipeline_mode<synchronous>, transform_indices = @transform_10, window_bounds = array<i64: 1, 1>}, {pipeline_mode = #tpu.pipeline_mode<synchronous>, transform_indices = @transform_11, window_bounds = array<i64: 16, 16>}, {pipeline_mode = #tpu.pipeline_mode<synchronous>, transform_indices = @transform_12, window_bounds = array<i64: 16, 128>}]} {
    %c0 = arith.constant 0 : index
    %c0_0 = arith.constant 0 : index
    %0 = vector.load %arg1[%c0, %c0_0] : memref<16x16xf32, #tpu.memory_space<vmem>>, vector<16x16xf32>
    %c0_1 = arith.constant 0 : index
    %c0_2 = arith.constant 0 : index
    %1 = vector.load %arg2[%c0_1, %c0_2] : memref<16x16xf32, #tpu.memory_space<vmem>>, vector<16x16xf32>
    %c0_3 = arith.constant 0 : index
    %c0_4 = arith.constant 0 : index
    %2 = vector.load %arg4[%c0_3, %c0_4] : memref<16x4xf32, #tpu.memory_space<vmem>>, vector<16x4xf32>
    %c0_5 = arith.constant 0 : index
    %c0_6 = arith.constant 0 : index
    %3 = vector.load %arg5[%c0_5, %c0_6] : memref<4x8xf32, #tpu.memory_space<vmem>>, vector<4x8xf32>
    %cst = arith.constant dense<0.000000e+00> : vector<16x8xf32>
    %4 = tpu.matmul %2, %3, %cst {dimension_numbers = #tpu.dot_dimension_numbers<[1], [0], [0], [1], [0, 0, 1, 1], [], []>} : vector<16x4xf32>, vector<4x8xf32>, vector<16x8xf32> -> vector<16x8xf32>
    %cst_7 = arith.constant dense<0.000000e+00> : vector<16x8xf32>
    %5 = tpu.matmul %0, %4, %cst_7 {dimension_numbers = #tpu.dot_dimension_numbers<[1], [0], [0], [1], [0, 0, 1, 1], [], []>} : vector<16x16xf32>, vector<16x8xf32>, vector<16x8xf32> -> vector<16x8xf32>
    %c0_8 = arith.constant 0 : index
    %c0_9 = arith.constant 0 : index
    %6 = vector.load %arg6[%c0_8, %c0_9] : memref<1x8xf32, #tpu.memory_space<vmem>>, vector<1x8xf32>
    %7 = vector.broadcast %6 : vector<1x8xf32> to vector<16x8xf32>
    %8 = arith.addf %5, %7 : vector<16x8xf32>
    %9 = math.tanh %8 : vector<16x8xf32>
    %c0_10 = arith.constant 0 : index
    %c0_11 = arith.constant 0 : index
    %10 = vector.load %arg7[%c0_10, %c0_11] : memref<8x8xf32, #tpu.memory_space<vmem>>, vector<8x8xf32>
    %cst_12 = arith.constant dense<0.000000e+00> : vector<16x8xf32>
    %11 = tpu.matmul %9, %10, %cst_12 {dimension_numbers = #tpu.dot_dimension_numbers<[1], [0], [0], [1], [0, 0, 1, 1], [], []>} : vector<16x8xf32>, vector<8x8xf32>, vector<16x8xf32> -> vector<16x8xf32>
    %cst_13 = arith.constant dense<0.000000e+00> : vector<16x8xf32>
    %12 = tpu.matmul %0, %11, %cst_13 {dimension_numbers = #tpu.dot_dimension_numbers<[1], [0], [0], [1], [0, 0, 1, 1], [], []>} : vector<16x16xf32>, vector<16x8xf32>, vector<16x8xf32> -> vector<16x8xf32>
    %c0_14 = arith.constant 0 : index
    %c0_15 = arith.constant 0 : index
    %13 = vector.load %arg8[%c0_14, %c0_15] : memref<1x8xf32, #tpu.memory_space<vmem>>, vector<1x8xf32>
    %14 = vector.broadcast %13 : vector<1x8xf32> to vector<16x8xf32>
    %15 = arith.addf %12, %14 : vector<16x8xf32>
    %16 = math.tanh %15 : vector<16x8xf32>
    %c0_16 = arith.constant 0 : index
    %c0_17 = arith.constant 0 : index
    %17 = vector.load %arg9[%c0_16, %c0_17] : memref<8x8xf32, #tpu.memory_space<vmem>>, vector<8x8xf32>
    %cst_18 = arith.constant dense<0.000000e+00> : vector<16x8xf32>
    %18 = tpu.matmul %16, %17, %cst_18 {dimension_numbers = #tpu.dot_dimension_numbers<[1], [0], [0], [1], [0, 0, 1, 1], [], []>} : vector<16x8xf32>, vector<8x8xf32>, vector<16x8xf32> -> vector<16x8xf32>
    %cst_19 = arith.constant dense<0.000000e+00> : vector<16x16xf32>
    %19 = tpu.matmul %16, %18, %cst_19 {dimension_numbers = #tpu.dot_dimension_numbers<[1], [1], [0], [0], [0, 0, 1, 0], [], []>} : vector<16x8xf32>, vector<16x8xf32>, vector<16x16xf32> -> vector<16x16xf32>
    %cst_20 = arith.constant 0.000000e+00 : f32
    %20 = vector.broadcast %cst_20 : f32 to vector<16x16xf32>
    %21 = arith.cmpf ogt, %19, %20 : vector<16x16xf32>
    %cst_21 = arith.constant 2.000000e-01 : f32
    %22 = vector.broadcast %cst_21 : f32 to vector<16x16xf32>
    %23 = arith.mulf %22, %19 : vector<16x16xf32>
    %24 = arith.select %21, %19, %23 : vector<16x16xi1>, vector<16x16xf32>
    %cst_22 = arith.constant 0.000000e+00 : f32
    %25 = vector.broadcast %cst_22 : f32 to vector<16x16xf32>
    %26 = arith.cmpf ogt, %1, %25 : vector<16x16xf32>
    %cst_23 = arith.constant -1.000000e+30 : f32
    %27 = vector.broadcast %cst_23 : f32 to vector<16x16xf32>
    %28 = arith.select %26, %24, %27 : vector<16x16xi1>, vector<16x16xf32>
    %cst_24 = arith.constant dense<0xFF800000> : vector<16xf32>
    %29 = vector.multi_reduction <maximumf>, %28, %cst_24 [1] : vector<16x16xf32> to vector<16xf32>
    %30 = vector.shape_cast %29 : vector<16xf32> to vector<16x1xf32>
    %31 = vector.broadcast %30 : vector<16x1xf32> to vector<16x16xf32>
    %32 = arith.subf %28, %31 : vector<16x16xf32>
    %33 = math.exp %32 : vector<16x16xf32>
    %cst_25 = arith.constant dense<0.000000e+00> : vector<16xf32>
    %34 = vector.multi_reduction <add>, %33, %cst_25 [1] : vector<16x16xf32> to vector<16xf32>
    %35 = vector.shape_cast %34 : vector<16xf32> to vector<16x1xf32>
    %cst_26 = arith.constant 1.000000e-16 : f32
    %36 = vector.broadcast %cst_26 : f32 to vector<16x1xf32>
    %37 = arith.addf %35, %36 : vector<16x1xf32>
    %38 = vector.broadcast %37 : vector<16x1xf32> to vector<16x16xf32>
    %39 = arith.divf %33, %38 : vector<16x16xf32>
    %c0_27 = arith.constant 0 : index
    %c0_28 = arith.constant 0 : index
    %40 = vector.load %arg12[%c0_27, %c0_28] : memref<16x16xf32, #tpu.memory_space<vmem>>, vector<16x16xf32>
    tpu.vector_store %arg12[%c0_27, %c0_28], %39 {strides = array<i32>} : memref<16x16xf32, #tpu.memory_space<vmem>>, vector<16x16xf32>,
    %cst_29 = arith.constant dense<0.000000e+00> : vector<16x8xf32>
    %41 = tpu.matmul %39, %16, %cst_29 {dimension_numbers = #tpu.dot_dimension_numbers<[1], [0], [0], [1], [0, 0, 1, 1], [], []>} : vector<16x16xf32>, vector<16x8xf32>, vector<16x8xf32> -> vector<16x8xf32>
    %c0_30 = arith.constant 0 : index
    %c0_31 = arith.constant 0 : index
    %42 = vector.load %arg10[%c0_30, %c0_31] : memref<8x3xf32, #tpu.memory_space<vmem>>, vector<8x3xf32>
    %cst_32 = arith.constant dense<0.000000e+00> : vector<16x3xf32>
    %43 = tpu.matmul %41, %42, %cst_32 {dimension_numbers = #tpu.dot_dimension_numbers<[1], [0], [0], [1], [0, 0, 1, 1], [], []>} : vector<16x8xf32>, vector<8x3xf32>, vector<16x3xf32> -> vector<16x3xf32>
    %44 = vector.extract_strided_slice %43 {offsets = [0, 0], sizes = [16, 1], strides = [1, 1]} : vector<16x3xf32> to vector<16x1xf32>
    %c0_33 = arith.constant 0 : index
    %c0_34 = arith.constant 0 : index
    %45 = vector.load %arg3[%c0_33, %c0_34] : memref<16x1xf32, #tpu.memory_space<vmem>>, vector<16x1xf32>
    %46 = vector.extract_strided_slice %43 {offsets = [0, 1], sizes = [16, 1], strides = [1, 1]} : vector<16x3xf32> to vector<16x1xf32>
    %47 = arith.mulf %45, %46 : vector<16x1xf32>
    %48 = arith.addf %44, %47 : vector<16x1xf32>
    %49 = vector.extract_strided_slice %43 {offsets = [0, 2], sizes = [16, 1], strides = [1, 1]} : vector<16x3xf32> to vector<16x1xf32>
    %cst_35 = arith.constant dense<0.000000e+00> : vector<16x1xf32>
    %50 = tpu.matmul %1, %49, %cst_35 {dimension_numbers = #tpu.dot_dimension_numbers<[1], [0], [0], [1], [0, 0, 1, 1], [], []>} : vector<16x16xf32>, vector<16x1xf32>, vector<16x1xf32> -> vector<16x1xf32>
    %51 = arith.subf %48, %50 : vector<16x1xf32>
    %c0_36 = arith.constant 0 : index
    %c0_37 = arith.constant 0 : index
    %52 = vector.load %arg11[%c0_36, %c0_37] : memref<1x1xf32, #tpu.memory_space<vmem>>, vector<1x1xf32>
    %53 = vector.broadcast %52 : vector<1x1xf32> to vector<16x1xf32>
    %54 = arith.addf %51, %53 : vector<16x1xf32>
    %55 = arith.negf %54 : vector<16x1xf32>
    %56 = math.exp %55 : vector<16x1xf32>
    %cst_38 = arith.constant 1.000000e+00 : f32
    %57 = vector.broadcast %cst_38 : f32 to vector<16x1xf32>
    %58 = arith.addf %57, %56 : vector<16x1xf32>
    %59 = arith.divf %57, %58 : vector<16x1xf32>
    %cst_39 = arith.constant 0.000000e+00 : f32
    %60 = vector.broadcast %cst_39 : f32 to vector<16x119xf32>
    %61 = tpu.concatenate %41, %59, %60 in 1 : vector<16x8xf32>, vector<16x1xf32>, vector<16x119xf32> -> vector<16x128xf32>
    %c0_40 = arith.constant 0 : index
    %c0_41 = arith.constant 0 : index
    %62 = vector.load %arg13[%c0_40, %c0_41] : memref<16x128xf32, #tpu.memory_space<vmem>>, vector<16x128xf32>
    tpu.vector_store %arg13[%c0_40, %c0_41], %61 {strides = array<i32>} : memref<16x128xf32, #tpu.memory_space<vmem>>, vector<16x128xf32>,
    return
  }
  func.func @transform_0(%arg0: i32) -> (i32, i32) {
    %c0_i32 = arith.constant 0 : i32
    %c0_i32_0 = arith.constant 0 : i32
    %c0_i32_1 = arith.constant 0 : i32
    return %c0_i32, %c0_i32_0 : i32, i32
  }
  func.func @transform_1(%arg0: i32) -> (i32, i32) {
    %c0_i32 = arith.constant 0 : i32
    %c0_i32_0 = arith.constant 0 : i32
    %c0_i32_1 = arith.constant 0 : i32
    return %c0_i32, %c0_i32_0 : i32, i32
  }
  func.func @transform_2(%arg0: i32) -> (i32, i32) {
    %c0_i32 = arith.constant 0 : i32
    %c0_i32_0 = arith.constant 0 : i32
    %c0_i32_1 = arith.constant 0 : i32
    return %c0_i32, %c0_i32_0 : i32, i32
  }
  func.func @transform_3(%arg0: i32) -> (i32, i32) {
    %c0_i32 = arith.constant 0 : i32
    %c0_i32_0 = arith.constant 0 : i32
    %c0_i32_1 = arith.constant 0 : i32
    return %c0_i32, %c0_i32_0 : i32, i32
  }
  func.func @transform_4(%arg0: i32) -> (i32, i32) {
    %c0_i32 = arith.constant 0 : i32
    %c0_i32_0 = arith.constant 0 : i32
    %c0_i32_1 = arith.constant 0 : i32
    return %c0_i32, %c0_i32_0 : i32, i32
  }
  func.func @transform_5(%arg0: i32) -> (i32, i32) {
    %c0_i32 = arith.constant 0 : i32
    %c0_i32_0 = arith.constant 0 : i32
    %c0_i32_1 = arith.constant 0 : i32
    return %c0_i32, %c0_i32_0 : i32, i32
  }
  func.func @transform_6(%arg0: i32) -> (i32, i32) {
    %c0_i32 = arith.constant 0 : i32
    %c0_i32_0 = arith.constant 0 : i32
    %c0_i32_1 = arith.constant 0 : i32
    return %c0_i32, %c0_i32_0 : i32, i32
  }
  func.func @transform_7(%arg0: i32) -> (i32, i32) {
    %c0_i32 = arith.constant 0 : i32
    %c0_i32_0 = arith.constant 0 : i32
    %c0_i32_1 = arith.constant 0 : i32
    return %c0_i32, %c0_i32_0 : i32, i32
  }
  func.func @transform_8(%arg0: i32) -> (i32, i32) {
    %c0_i32 = arith.constant 0 : i32
    %c0_i32_0 = arith.constant 0 : i32
    %c0_i32_1 = arith.constant 0 : i32
    return %c0_i32, %c0_i32_0 : i32, i32
  }
  func.func @transform_9(%arg0: i32) -> (i32, i32) {
    %c0_i32 = arith.constant 0 : i32
    %c0_i32_0 = arith.constant 0 : i32
    %c0_i32_1 = arith.constant 0 : i32
    return %c0_i32, %c0_i32_0 : i32, i32
  }
  func.func @transform_10(%arg0: i32) -> (i32, i32) {
    %c0_i32 = arith.constant 0 : i32
    %c0_i32_0 = arith.constant 0 : i32
    %c0_i32_1 = arith.constant 0 : i32
    return %c0_i32, %c0_i32_0 : i32, i32
  }
  func.func @transform_11(%arg0: i32) -> (i32, i32) {
    %c0_i32 = arith.constant 0 : i32
    %c0_i32_0 = arith.constant 0 : i32
    %c0_i32_1 = arith.constant 0 : i32
    return %c0_i32, %c0_i32_0 : i32, i32
  }
  func.func @transform_12(%arg0: i32) -> (i32, i32) {
    %c0_i32 = arith.constant 0 : i32
    %c0_i32_0 = arith.constant 0 : i32
    %c0_i32_1 = arith.constant 0 : i32
    return %c0_i32, %c0_i32_0 : i32, i32
  }
}

module attributes {stable_mosaic.version = 11 : i64} {
  func.func @_decoder_kernel(%arg0: i32, %arg1: memref<16x16xf32, #tpu.memory_space<vmem>>, %arg2: memref<16x16xf32, #tpu.memory_space<vmem>>, %arg3: memref<8x16xf32, #tpu.memory_space<vmem>>, %arg4: memref<8x128xf32, #tpu.memory_space<vmem>>, %arg5: memref<8x8xf32, #tpu.memory_space<vmem>>, %arg6: memref<1x8xf32, #tpu.memory_space<vmem>>, %arg7: memref<8x8xf32, #tpu.memory_space<vmem>>, %arg8: memref<1x8xf32, #tpu.memory_space<vmem>>, %arg9: memref<8x4xf32, #tpu.memory_space<vmem>>, %arg10: memref<1x4xf32, #tpu.memory_space<vmem>>, %arg11: memref<16x4xf32, #tpu.memory_space<vmem>>, %arg12: memref<16x16xf32, #tpu.memory_space<vmem>>) attributes {dimension_semantics = [#tpu.dimension_semantics<arbitrary>], iteration_bounds = array<i64: 1>, scalar_prefetch = 0 : i64, scratch_operands = 0 : i64, tpu.core_type = #tpu.core_type<tc>, window_params = [{pipeline_mode = #tpu.pipeline_mode<synchronous>, transform_indices = @transform_0, window_bounds = array<i64: 16, 16>}, {pipeline_mode = #tpu.pipeline_mode<synchronous>, transform_indices = @transform_1, window_bounds = array<i64: 16, 16>}, {pipeline_mode = #tpu.pipeline_mode<synchronous>, transform_indices = @transform_2, window_bounds = array<i64: 8, 16>}, {pipeline_mode = #tpu.pipeline_mode<synchronous>, transform_indices = @transform_3, window_bounds = array<i64: 8, 128>}, {pipeline_mode = #tpu.pipeline_mode<synchronous>, transform_indices = @transform_4, window_bounds = array<i64: 8, 8>}, {pipeline_mode = #tpu.pipeline_mode<synchronous>, transform_indices = @transform_5, window_bounds = array<i64: 1, 8>}, {pipeline_mode = #tpu.pipeline_mode<synchronous>, transform_indices = @transform_6, window_bounds = array<i64: 8, 8>}, {pipeline_mode = #tpu.pipeline_mode<synchronous>, transform_indices = @transform_7, window_bounds = array<i64: 1, 8>}, {pipeline_mode = #tpu.pipeline_mode<synchronous>, transform_indices = @transform_8, window_bounds = array<i64: 8, 4>}, {pipeline_mode = #tpu.pipeline_mode<synchronous>, transform_indices = @transform_9, window_bounds = array<i64: 1, 4>}, {pipeline_mode = #tpu.pipeline_mode<synchronous>, transform_indices = @transform_10, window_bounds = array<i64: 16, 4>}, {pipeline_mode = #tpu.pipeline_mode<synchronous>, transform_indices = @transform_11, window_bounds = array<i64: 16, 16>}]} {
    %c0 = arith.constant 0 : index
    %c0_0 = arith.constant 0 : index
    %0 = vector.load %arg1[%c0, %c0_0] : memref<16x16xf32, #tpu.memory_space<vmem>>, vector<16x16xf32>
    %c0_1 = arith.constant 0 : index
    %c0_2 = arith.constant 0 : index
    %1 = vector.load %arg2[%c0_1, %c0_2] : memref<16x16xf32, #tpu.memory_space<vmem>>, vector<16x16xf32>
    %c0_3 = arith.constant 0 : index
    %c0_4 = arith.constant 0 : index
    %2 = vector.load %arg3[%c0_3, %c0_4] : memref<8x16xf32, #tpu.memory_space<vmem>>, vector<8x16xf32>
    %c0_5 = arith.constant 0 : index
    %c0_6 = arith.constant 0 : index
    %3 = vector.load %arg4[%c0_5, %c0_6] : memref<8x128xf32, #tpu.memory_space<vmem>>, vector<8x128xf32>
    %4 = vector.extract_strided_slice %3 {offsets = [0, 0], sizes = [8, 8], strides = [1, 1]} : vector<8x128xf32> to vector<8x8xf32>
    %5 = vector.extract_strided_slice %3 {offsets = [0, 8], sizes = [8, 1], strides = [1, 1]} : vector<8x128xf32> to vector<8x1xf32>
    %6 = vector.broadcast %5 : vector<8x1xf32> to vector<8x8xf32>
    %7 = arith.mulf %4, %6 : vector<8x8xf32>
    %cst = arith.constant dense<0.000000e+00> : vector<16x8xf32>
    %8 = tpu.matmul %1, %2, %cst {dimension_numbers = #tpu.dot_dimension_numbers<[1], [1], [0], [0], [0, 0, 1, 0], [], []>} : vector<16x16xf32>, vector<8x16xf32>, vector<16x8xf32> -> vector<16x8xf32>
    %cst_7 = arith.constant dense<0.000000e+00> : vector<8x8xf32>
    %9 = tpu.matmul %2, %8, %cst_7 {dimension_numbers = #tpu.dot_dimension_numbers<[1], [0], [0], [1], [0, 0, 1, 1], [], []>} : vector<8x16xf32>, vector<16x8xf32>, vector<8x8xf32> -> vector<8x8xf32>
    %cst_8 = arith.constant dense<0.000000e+00> : vector<16x8xf32>
    %10 = tpu.matmul %2, %7, %cst_8 {dimension_numbers = #tpu.dot_dimension_numbers<[0], [0], [1], [1], [0, 1, 1, 1], [], []>} : vector<8x16xf32>, vector<8x8xf32>, vector<16x8xf32> -> vector<16x8xf32>
    %cst_9 = arith.constant dense<0.000000e+00> : vector<16x8xf32>
    %11 = tpu.matmul %2, %9, %cst_9 {dimension_numbers = #tpu.dot_dimension_numbers<[0], [0], [1], [1], [0, 1, 1, 1], [], []>} : vector<8x16xf32>, vector<8x8xf32>, vector<16x8xf32> -> vector<16x8xf32>
    %cst_10 = arith.constant dense<0.000000e+00> : vector<16x16xf32>
    %12 = tpu.matmul %11, %2, %cst_10 {dimension_numbers = #tpu.dot_dimension_numbers<[1], [0], [0], [1], [0, 0, 1, 1], [], []>} : vector<16x8xf32>, vector<8x16xf32>, vector<16x16xf32> -> vector<16x16xf32>
    %c0_11 = arith.constant 0 : index
    %c0_12 = arith.constant 0 : index
    %13 = vector.load %arg12[%c0_11, %c0_12] : memref<16x16xf32, #tpu.memory_space<vmem>>, vector<16x16xf32>
    tpu.vector_store %arg12[%c0_11, %c0_12], %12 {strides = array<i32>} : memref<16x16xf32, #tpu.memory_space<vmem>>, vector<16x16xf32>,
    %c0_13 = arith.constant 0 : index
    %c0_14 = arith.constant 0 : index
    %14 = vector.load %arg5[%c0_13, %c0_14] : memref<8x8xf32, #tpu.memory_space<vmem>>, vector<8x8xf32>
    %cst_15 = arith.constant dense<0.000000e+00> : vector<16x8xf32>
    %15 = tpu.matmul %10, %14, %cst_15 {dimension_numbers = #tpu.dot_dimension_numbers<[1], [0], [0], [1], [0, 0, 1, 1], [], []>} : vector<16x8xf32>, vector<8x8xf32>, vector<16x8xf32> -> vector<16x8xf32>
    %cst_16 = arith.constant dense<0.000000e+00> : vector<16x8xf32>
    %16 = tpu.matmul %0, %15, %cst_16 {dimension_numbers = #tpu.dot_dimension_numbers<[1], [0], [0], [1], [0, 0, 1, 1], [], []>} : vector<16x16xf32>, vector<16x8xf32>, vector<16x8xf32> -> vector<16x8xf32>
    %c0_17 = arith.constant 0 : index
    %c0_18 = arith.constant 0 : index
    %17 = vector.load %arg6[%c0_17, %c0_18] : memref<1x8xf32, #tpu.memory_space<vmem>>, vector<1x8xf32>
    %18 = vector.broadcast %17 : vector<1x8xf32> to vector<16x8xf32>
    %19 = arith.addf %16, %18 : vector<16x8xf32>
    %20 = math.tanh %19 : vector<16x8xf32>
    %c0_19 = arith.constant 0 : index
    %c0_20 = arith.constant 0 : index
    %21 = vector.load %arg7[%c0_19, %c0_20] : memref<8x8xf32, #tpu.memory_space<vmem>>, vector<8x8xf32>
    %cst_21 = arith.constant dense<0.000000e+00> : vector<16x8xf32>
    %22 = tpu.matmul %20, %21, %cst_21 {dimension_numbers = #tpu.dot_dimension_numbers<[1], [0], [0], [1], [0, 0, 1, 1], [], []>} : vector<16x8xf32>, vector<8x8xf32>, vector<16x8xf32> -> vector<16x8xf32>
    %cst_22 = arith.constant dense<0.000000e+00> : vector<16x8xf32>
    %23 = tpu.matmul %0, %22, %cst_22 {dimension_numbers = #tpu.dot_dimension_numbers<[1], [0], [0], [1], [0, 0, 1, 1], [], []>} : vector<16x16xf32>, vector<16x8xf32>, vector<16x8xf32> -> vector<16x8xf32>
    %c0_23 = arith.constant 0 : index
    %c0_24 = arith.constant 0 : index
    %24 = vector.load %arg8[%c0_23, %c0_24] : memref<1x8xf32, #tpu.memory_space<vmem>>, vector<1x8xf32>
    %25 = vector.broadcast %24 : vector<1x8xf32> to vector<16x8xf32>
    %26 = arith.addf %23, %25 : vector<16x8xf32>
    %27 = math.tanh %26 : vector<16x8xf32>
    %c0_25 = arith.constant 0 : index
    %c0_26 = arith.constant 0 : index
    %28 = vector.load %arg9[%c0_25, %c0_26] : memref<8x4xf32, #tpu.memory_space<vmem>>, vector<8x4xf32>
    %cst_27 = arith.constant dense<0.000000e+00> : vector<16x4xf32>
    %29 = tpu.matmul %27, %28, %cst_27 {dimension_numbers = #tpu.dot_dimension_numbers<[1], [0], [0], [1], [0, 0, 1, 1], [], []>} : vector<16x8xf32>, vector<8x4xf32>, vector<16x4xf32> -> vector<16x4xf32>
    %cst_28 = arith.constant dense<0.000000e+00> : vector<16x4xf32>
    %30 = tpu.matmul %0, %29, %cst_28 {dimension_numbers = #tpu.dot_dimension_numbers<[1], [0], [0], [1], [0, 0, 1, 1], [], []>} : vector<16x16xf32>, vector<16x4xf32>, vector<16x4xf32> -> vector<16x4xf32>
    %c0_29 = arith.constant 0 : index
    %c0_30 = arith.constant 0 : index
    %31 = vector.load %arg10[%c0_29, %c0_30] : memref<1x4xf32, #tpu.memory_space<vmem>>, vector<1x4xf32>
    %32 = vector.broadcast %31 : vector<1x4xf32> to vector<16x4xf32>
    %33 = arith.addf %30, %32 : vector<16x4xf32>
    %c0_31 = arith.constant 0 : index
    %c0_32 = arith.constant 0 : index
    %34 = vector.load %arg11[%c0_31, %c0_32] : memref<16x4xf32, #tpu.memory_space<vmem>>, vector<16x4xf32>
    tpu.vector_store %arg11[%c0_31, %c0_32], %33 {strides = array<i32>} : memref<16x4xf32, #tpu.memory_space<vmem>>, vector<16x4xf32>,
    return
  }
  func.func @transform_0(%arg0: i32) -> (i32, i32) {
    %c0_i32 = arith.constant 0 : i32
    %c0_i32_0 = arith.constant 0 : i32
    %c0_i32_1 = arith.constant 0 : i32
    return %c0_i32, %c0_i32_0 : i32, i32
  }
  func.func @transform_1(%arg0: i32) -> (i32, i32) {
    %c0_i32 = arith.constant 0 : i32
    %c0_i32_0 = arith.constant 0 : i32
    %c0_i32_1 = arith.constant 0 : i32
    return %c0_i32, %c0_i32_0 : i32, i32
  }
  func.func @transform_2(%arg0: i32) -> (i32, i32) {
    %c0_i32 = arith.constant 0 : i32
    %c0_i32_0 = arith.constant 0 : i32
    %c0_i32_1 = arith.constant 0 : i32
    return %c0_i32, %c0_i32_0 : i32, i32
  }
  func.func @transform_3(%arg0: i32) -> (i32, i32) {
    %c0_i32 = arith.constant 0 : i32
    %c0_i32_0 = arith.constant 0 : i32
    %c0_i32_1 = arith.constant 0 : i32
    return %c0_i32, %c0_i32_0 : i32, i32
  }
  func.func @transform_4(%arg0: i32) -> (i32, i32) {
    %c0_i32 = arith.constant 0 : i32
    %c0_i32_0 = arith.constant 0 : i32
    %c0_i32_1 = arith.constant 0 : i32
    return %c0_i32, %c0_i32_0 : i32, i32
  }
  func.func @transform_5(%arg0: i32) -> (i32, i32) {
    %c0_i32 = arith.constant 0 : i32
    %c0_i32_0 = arith.constant 0 : i32
    %c0_i32_1 = arith.constant 0 : i32
    return %c0_i32, %c0_i32_0 : i32, i32
  }
  func.func @transform_6(%arg0: i32) -> (i32, i32) {
    %c0_i32 = arith.constant 0 : i32
    %c0_i32_0 = arith.constant 0 : i32
    %c0_i32_1 = arith.constant 0 : i32
    return %c0_i32, %c0_i32_0 : i32, i32
  }
  func.func @transform_7(%arg0: i32) -> (i32, i32) {
    %c0_i32 = arith.constant 0 : i32
    %c0_i32_0 = arith.constant 0 : i32
    %c0_i32_1 = arith.constant 0 : i32
    return %c0_i32, %c0_i32_0 : i32, i32
  }
  func.func @transform_8(%arg0: i32) -> (i32, i32) {
    %c0_i32 = arith.constant 0 : i32
    %c0_i32_0 = arith.constant 0 : i32
    %c0_i32_1 = arith.constant 0 : i32
    return %c0_i32, %c0_i32_0 : i32, i32
  }
  func.func @transform_9(%arg0: i32) -> (i32, i32) {
    %c0_i32 = arith.constant 0 : i32
    %c0_i32_0 = arith.constant 0 : i32
    %c0_i32_1 = arith.constant 0 : i32
    return %c0_i32, %c0_i32_0 : i32, i32
  }
  func.func @transform_10(%arg0: i32) -> (i32, i32) {
    %c0_i32 = arith.constant 0 : i32
    %c0_i32_0 = arith.constant 0 : i32
    %c0_i32_1 = arith.constant 0 : i32
    return %c0_i32, %c0_i32_0 : i32, i32
  }
  func.func @transform_11(%arg0: i32) -> (i32, i32) {
    %c0_i32 = arith.constant 0 : i32
    %c0_i32_0 = arith.constant 0 : i32
    %c0_i32_1 = arith.constant 0 : i32
    return %c0_i32, %c0_i32_0 : i32, i32
  }
}

</mosaic_0001>

<bundles_post_ra>
// kernel: asap_ae_forward.3
= control target key start
LH: loop header
LB: loop body
LE: loop exit
PB: predicated region body
PF: predicated region fallthrough
CT: control target
= control target key end

     0   :  { %vm50_vm0 = vcmask 130048   ;;  %s1327_s0 = inlined_call_operand.vmem [shape: f32[16,16], index: 0, kind: input, shape index: {}]   ;;  %s1328_s1 = inlined_call_operand.vmem [shape: f32[16,16], index: 1, kind: input, shape index: {}]   ;;  %s1329_s2 = inlined_call_operand.vmem [shape: f32[8,16], index: 2, kind: input, shape index: {}]   ;;  %s1330_s3 = inlined_call_operand.vmem [shape: f32[8,128], index: 3, kind: input, shape index: {}]   ;;  %s1331_s4 = inlined_call_operand.vmem [shape: f32[8,8], index: 4, kind: input, shape index: {}]   ;;  %s1332_s5 = inlined_call_operand.vmem [shape: f32[1,8], index: 5, kind: input, shape index: {}]   ;;  %s1333_s6 = inlined_call_operand.vmem [shape: f32[8,8], index: 6, kind: input, shape index: {}]   ;;  %s1334_s7 = inlined_call_operand.vmem [shape: f32[1,8], index: 7, kind: input, shape index: {}]   ;;  %s1335_s8 = inlined_call_operand.vmem [shape: f32[8,4], index: 8, kind: input, shape index: {}]   ;;  %s1336_s9 = inlined_call_operand.vmem [shape: f32[1,4], index: 9, kind: input, shape index: {}]   ;;  %s1337_s10 = inlined_call_operand.vmem [shape: f32[16,4], index: 10, kind: output, shape index: {0}]   ;;  %s1338_s11 = inlined_call_operand.hbm [shape: f32[16,16], index: 11, kind: output, shape index: {1}]  }
   0x1   :  { %v42_v0 = vld [vmem:[%s1329_s2] sm:$0xff] }
   0x2   :  { %v40_v1 = vld [vmem:[%s1328_s1] sm:$0xff]  ;;  %1063 = vmatprep.subr.msk.mxu0 %vm50_vm0, %v42_v0 }
   0x3   :  { %1065 = vmatprep.mubr.msk.f32.mxu0 %vm50_vm0, %v40_v1  ;;  %v43_v2 = vld [vmem:[%s1330_s3] sm:$0xff] }
   0x4   :  { %17 = vsyncpa [#allocation3], 0  ;;  %1064 = vmatpush3.xpose.msk.msra.mxu0 %vm50_vm0, %v42_v0  ;;  %v41_v3 = vld [vmem:[%s1328_s1 + $0x8] sm:$0xff]  ;;  %v1181_v4 = vmov 8   ;;  %v1182_v5 = vmov 0.0|0.0   ;;  %vm1183_vm1 = vmmov 0  }
   0x5   :  { %1148 = vset.pattern.permute.xlu0 %v1181_v4  ;;  %1126 = vmatprep.subr.bf16.mxu1 %v1182_v5  ;;  %v1184_v6 = vmov 0.0   ;;  %vm237_vm2 = vcmask 64512   ;;  %v477_v17 = vld [vmem:[%s1331_s4] sm:$0xff]  ;;  %v39_v25 = vld [vmem:[%s1327_s0 + $0x8] sm:$0xff] }
   0x6   :  { %46 = vperm.xlu0 %1148, %v43_v2   ;;  %1072 = vmatprep.mubr.msk.f32.mxu1 %vm1183_vm1, %v1184_v6  ;;  %v38_v21 = vld [vmem:[%s1327_s0] sm:$0xff] }
   0x7   :  { %1066 = vmatmul.mubr.msk.f32.vlgmr.msra.gmra.mrb[0].mxu0 %vm50_vm0, %v41_v3  ;;  %v649_v26 = vld [vmem:[%s1333_s6] sm:$0xff] }
   0x8   :  { %v1014_v29 = vld [vmem:[%s1332_s5] ss:$0 sm:$0xff] }
   0x9   :  { %v815_v39 = vld [vmem:[%s1335_s8] sm:$0xff] }
   0xa   :  { %v1019_v40 = vld [vmem:[%s1334_s7] ss:$0 sm:$0xff]  ;;  %s1185_s7 = smov [#allocation2]  }
   0xb   :  { %s989_s8 = sshll.u32 %s1185_s7, 4  ;;  %s990_s8 = int_to_ptr.vmem [resolvable:$true] %s989_s8 }
   0xc   :  { %s1157_s13 = scalar_lea.vmem %s990_s8, 256  ;;  %p1162_p1 = scmp.lt.s32.totalorder %s990_s8, %s990_s8 }
   0xd   :  { %p1158_p0 = scmp.ne.s32.totalorder %s990_s8, %s1157_s13  ;;  %p1163_p2 = scmp.lt.s32.totalorder %s1157_s13, %s1157_s13 }
   0xf   :  { %p1164_p3 = por %p1163_p2, %p1162_p1 }
  0x11   :  { %p1165_p4 = pnand %p1164_p3, %p1158_p0 }
  0x24   :  { %205 = vxpose.xlu0.b32.start.end [1/1] (short) (narrow) %v42_v0, 16 }
  0x85   :  { %v47_v7 = vpop.permute.xlu0 %46 }
  0x86   :  { %v49_v8 = vmul.f32 %v47_v7, %v43_v2 }
  0x88   :  { %1075 = vmatprep.subr.mxu0 %v49_v8 }
  0x89   :  { %1076 = vmatpush3.msra.mxu0 %v49_v8 }
  0x8a   :  { %1085 = vmatprep.subr.mxu0 %v42_v0 }
  0xa4   :  { %v221_v9 = vpop.trf.xlu0 }
  0xa5   :  { %1077 = vmatprep.mubr.msk.f32.mxu0 %vm237_vm2, %v221_v9 }
  0xa8   :  { %v222_v10 = vpop.trf.xlu0 }
  0xa9   :  { %1078 = vmatmul.mubr.msk.f32.vlgmr.msra.gmra.mrb[2].mxu0 %vm237_vm2, %v222_v10 }
  0xaa   :  { %1086 = vmatpush3.msra.mxu0 %v42_v0 }
  0xda   :  { %v1067_v11 = vpop.f32.mrb[0].mxu0 }
  0xdb   :  { %v126_v12 = vpop.f32.mrb[1].mxu0 }
  0xdc   :  { %v1127_v13 = vpack.c.bf16 %v1067_v11, %v126_v12 }
  0xde   :  { %1128 = vmatpush3.bf16.msra.mxu1 %v1127_v13 }
  0xe1   :  { %1073 = vmatmul.mubr.msk.f32.vlgmr.msra.gmra.mrb[0].mxu1 %vm50_vm0, %v42_v0 }
  0xe2   :  { %1082 = vmatprep.mubr.msk.f32.mxu1 %vm237_vm2, %v221_v9 }
 0x17c   :  { %v1079_v14 = vpop.f32.mrb[2].mxu0 }
 0x17d   :  { %v310_v15 = vpop.f32.mrb[3].mxu0 }
 0x1b4   :  { %v201_v16 = vpop.f32.mrb[0].mxu1 }
 0x1b5   :  { %v1074_v18 = vpop.f32.mrb[1].mxu1  ;;  %1080 = vmatprep.subr.mxu1 %v201_v16 }
 0x1b6   :  { %1081 = vmatpush3.msra.mxu1 %v201_v16 }
 0x1b7   :  { %1083 = vmatmul.mubr.msk.f32.vlgmr.msra.gmra.mrb[2].mxu1 %vm237_vm2, %v222_v10  ;;  %1090 = vmatprep.subr.mxu1 %v477_v17 }
 0x1b8   :  { %1091 = vmatpush3.msra.mxu1 %v477_v17  ;;  %1092 = vmatprep.mubr.msk.f32.mxu1 %vm237_vm2, %v310_v15 }
 0x1b9   :  { %1102 = vmatprep.subr.mxu1 %v649_v26 }
 0x1bb   :  { %1093 = vmatmul.mubr.msk.f32.vlgmr.msra.gmra.mrb[4].mxu1 %vm237_vm2, %v1079_v14 }
 0x1bc   :  { %1103 = vmatpush3.msra.mxu1 %v649_v26 }
 0x1bd   :  { %1114 = vmatprep.subr.mxu1 %v815_v39 }
 0x28a   :  { %v1084_v19 = vpop.f32.mrb[2].mxu1 }
 0x28b   :  { %v385_v20 = vpop.f32.mrb[3].mxu1 }
 0x28c   :  { %1087 = vmatprep.mubr.msk.f32.mxu0 %vm237_vm2, %v385_v20 }
 0x28d   :  { %1088 = vmatmul.mubr.msk.f32.vlgmr.msra.gmra.mrb[4].mxu0 %vm237_vm2, %v1084_v19 }
 0x28e   :  { %v1094_v22 = vpop.f32.mrb[4].mxu1  ;;  %1099 = vmatprep.mubr.msk.f32.mxu0 %vm50_vm0, %v38_v21 }
 0x28f   :  { %v550_v23 = vpop.f32.mrb[5].mxu1 }
 0x290   :  { %v1129_v24 = vpack.c.bf16 %v1094_v22, %v550_v23 }
 0x292   :  { %1130 = vmatprep.subr.bf16.mxu0 %v1129_v24 }
 0x293   :  { %1132 = vmatpush3.bf16.msra.mxu0 %v1129_v24 }
 0x296   :  { %1100 = vmatmul.mubr.msk.f32.vlgmr.msra.gmra.mrb[6].mxu0 %vm50_vm0, %v39_v25 }
 0x297   :  { %1111 = vmatprep.mubr.msk.f32.mxu0 %vm50_vm0, %v38_v21 }
 0x360   :  { %v1089_v27 = vpop.f32.mrb[4].mxu0 }
 0x361   :  { %476 = vst.msk [vmem:[#allocation2 + $0x8] sm:$0xff] %vm50_vm0, %v1089_v27  ;;  %v466_v28 = vpop.f32.mrb[5].mxu0 }
 0x362   :  { %475 = vst.msk [vmem:[#allocation2] sm:$0xff] %vm50_vm0, %v466_v28 }
 0x369   :  { %v1101_v30 = vpop.f32.mrb[6].mxu0 }
 0x36a   :  { %v644_v31 = vadd.f32 %v1101_v30, %v1014_v29  ;;  %v638_v32 = vpop.f32.mrb[7].mxu0 }
 0x36b   :  { %v639_v33 = vadd.f32 %v1014_v29, %v638_v32 }
 0x36d   :  { %1149 = vtanh.f32 %v639_v33 }
 0x36e   :  { %1151 = vtanh.f32 %v644_v31 }
 0x377   :  { %v1150_v34 = vpop.eup %1149 }
 0x378   :  { %v1152_v35 = vpop.eup %1151  ;;  %1104 = vmatprep.mubr.msk.f32.mxu1 %vm237_vm2, %v1150_v34 }
 0x379   :  { %1105 = vmatmul.mubr.msk.f32.vlgmr.msra.gmra.mrb[6].mxu1 %vm237_vm2, %v1152_v35 }
 0x37a   :  { %1115 = vmatpush3.msra.mxu1 %v815_v39 }
 0x44c   :  { %v1106_v36 = vpop.f32.mrb[6].mxu1 }
 0x44d   :  { %v722_v37 = vpop.f32.mrb[7].mxu1 }
 0x44e   :  { %v1133_v38 = vpack.c.bf16 %v1106_v36, %v722_v37 }
 0x450   :  { %1134 = vmatprep.subr.bf16.mxu0 %v1133_v38 }
 0x451   :  { %1136 = vmatpush3.bf16.msra.mxu0 %v1133_v38 }
 0x454   :  { %1112 = vmatmul.mubr.msk.f32.vlgmr.msra.gmra.mrb[8].mxu0 %vm50_vm0, %v39_v25 }
 0x455   :  { %1123 = vmatprep.mubr.msk.f32.mxu0 %vm50_vm0, %v38_v21 }
 0x527   :  { %v1113_v41 = vpop.f32.mrb[8].mxu0 }
 0x528   :  { %v810_v42 = vadd.f32 %v1113_v41, %v1019_v40  ;;  %v804_v43 = vpop.f32.mrb[9].mxu0 }
 0x529   :  { %v805_v44 = vadd.f32 %v1019_v40, %v804_v43 }
 0x52b   :  { %1153 = vtanh.f32 %v805_v44 }
 0x52c   :  { %1155 = vtanh.f32 %v810_v42 }
 0x535   :  { %v1154_v45 = vpop.eup %1153 }
 0x536   :  { %v1156_v46 = vpop.eup %1155  ;;  %1116 = vmatprep.mubr.msk.f32.mxu1 %vm237_vm2, %v1154_v45 }
 0x537   :  { %1117 = vmatmul.mubr.msk.f32.vlgmr.msra.gmra.mrb[8].mxu1 %vm237_vm2, %v1156_v46 }
 0x60a   :  { %v1118_v47 = vpop.f32.mrb[8].mxu1 }
 0x60b   :  { %v888_v48 = vpop.f32.mrb[9].mxu1 }
 0x60c   :  { %v1137_v49 = vpack.c.bf16 %v1118_v47, %v888_v48 }
 0x60e   :  { %1138 = vmatprep.subr.bf16.mxu0 %v1137_v49 }
 0x60f   :  { %1140 = vmatpush3.bf16.msra.mxu0 %v1137_v49 }
 0x612   :  { %1124 = vmatmul.mubr.msk.f32.vlgmr.msra.gmra.mrb[10].mxu0 %vm50_vm0, %v39_v25 }
 0x613   :  { %1168 = shalt.err (!%p1165_p4)
}
 0x614   :  { %s1169_s16 = scalar_lea.hbm %s1338_s11, 256 }
 0x615   :  { %p1170_p5 = scmp.ne.s32.totalorder %s1338_s11, %s1169_s16  ;;  %p1173_p6 = scmp.lt.u32.totalorder %s1169_s16, %s1338_s11 }
 0x617   :  { %p1175_p7 = pnand %p1173_p6, %p1170_p5 }
 0x619   :  { %1178 = shalt.err (!%p1175_p7)
}
 0x61a   :  { %s1186_s21 = smov 128   ;;  %s1187_s22 = smov 8   ;;  %v1024_v50 = vld [vmem:[%s1336_s9] ss:$0 sm:$0xff]  ;;  %vm979_vm3 = vcmask 31744  }
 0x61b   :  { %995 = dma.vmem_to_hbm [thread:$0]  %s990_s8, 256, %s1338_s11, [#allocation3], %s1186_s21, %s1186_s21, %s1187_s22  }
 0x6e5   :  { %v1125_v51 = vpop.f32.mrb[10].mxu0 }
 0x6e6   :  { %v976_v52 = vadd.f32 %v1125_v51, %v1024_v50  ;;  %v970_v53 = vpop.f32.mrb[11].mxu0 }
 0x6e7   :  { %v971_v54 = vadd.f32 %v1024_v50, %v970_v53 }
 0x6e8   :  { %981 = vst.msk [vmem:[%s1337_s10 + $0x8] sm:$0xff] %vm979_vm3, %v976_v52 }
 0x6e9   :  { %980 = vst.msk [vmem:[%s1337_s10] sm:$0xff] %vm979_vm3, %v971_v54 }
 0x6ea   :  { %1179 = dma.done.wait [#allocation3], 256  }
 0x6eb   :  { %1180 = vsyncadd [#allocation3], 4294967040 }
 0x6ec   :  { %1001 = vsyncpa [#allocation3], 1 }

// kernel: asap_ae_forward.2
= control target key start
LH: loop header
LB: loop body
LE: loop exit
PB: predicated region body
PF: predicated region fallthrough
CT: control target
= control target key end

     0   :  { %vm56_vm0 = vcmask 1043456   ;;  %vm49_vm1 = vcmask 31744   ;;  %vm142_vm2 = vcmask 130048   ;;  %vm227_vm3 = vcmask 64512   ;;  %s1069_s24 = smov 127   ;;  %s1224_s4 = inlined_call_operand.vmem [shape: f32[4,8], index: 4, kind: input, shape index: {}]   ;;  %s1225_s3 = inlined_call_operand.vmem [shape: f32[16,4], index: 3, kind: input, shape index: {}]   ;;  %s1226_s0 = inlined_call_operand.vmem [shape: f32[16,16], index: 0, kind: input, shape index: {}]   ;;  %s1227_s6 = inlined_call_operand.vmem [shape: f32[8,8], index: 6, kind: input, shape index: {}]   ;;  %s1228_s5 = inlined_call_operand.vmem [shape: f32[1,8], index: 5, kind: input, shape index: {}]   ;;  %s1229_s8 = inlined_call_operand.vmem [shape: f32[8,8], index: 8, kind: input, shape index: {}]   ;;  %s1230_s7 = inlined_call_operand.vmem [shape: f32[1,8], index: 7, kind: input, shape index: {}]   ;;  %s1231_s1 = inlined_call_operand.vmem [shape: f32[16,16], index: 1, kind: input, shape index: {}]   ;;  %s1232_s9 = inlined_call_operand.vmem [shape: f32[8,3], index: 9, kind: input, shape index: {}]   ;;  %s1233_s11 = inlined_call_operand.vmem [shape: f32[16,16], index: 11, kind: output, shape index: {0}]   ;;  %s1234_s10 = inlined_call_operand.<no memory space> [shape: f32[1,1], index: 10, kind: input, shape index: {}]   ;;  %s1235_s2 = inlined_call_operand.vmem [shape: f32[16,1], index: 2, kind: input, shape index: {}]   ;;  %s1236_s12 = inlined_call_operand.vmem [shape: f32[16,128], index: 12, kind: output, shape index: {1}]  }
   0x1   :  { %v48_v0 = vld [vmem:[%s1224_s4] sm:$0xf]  ;;  %v47_v2 = vld [vmem:[%s1225_s3 + $0x8] sm:$0xff]  ;;  %vm1024_vm4 = vmpackc.low %vm227_vm3, %vm227_vm3  ;;  %vm889_vm9 = vcmask 72704  }
   0x2   :  { %v46_v1 = vld [vmem:[%s1225_s3] sm:$0xff]  ;;  %960 = vmatprep.subr.msk.mxu0 %vm56_vm0, %v48_v0  ;;  %v43_v7 = vld [vmem:[%s1226_s0 + $0x8] sm:$0xff] }
   0x3   :  { %962 = vmatprep.mubr.msk.f32.mxu0 %vm49_vm1, %v46_v1  ;;  %961 = vmatpush3.msk.msra.mxu0 %vm56_vm0, %v48_v0  ;;  %v42_v3 = vld [vmem:[%s1226_s0] sm:$0xff]  ;;  %v1183_v35 = vld [vmem:[%s1231_s1 + $0x8] sm:$0xff]  ;;  %v18_v1 = vstv %s1234_s10 }
   0x4   :  { %963 = vmatmul.mubr.msk.f32.vlgmr.msra.gmra.mrb[0].mxu0 %vm49_vm1, %v47_v2  ;;  %969 = vmatprep.mubr.msk.f32.mxu1 %vm142_vm2, %v42_v3  ;;  %v226_v8 = vld [vmem:[%s1227_s6] sm:$0xff]  ;;  %vm563_vm8 = vcmp.gt.f32.partialorder %v1183_v35, 0.0  ;;  %19 = vst [vmem:[#allocation2] sm:$0x1] %v18_v1 }
   0x5   :  { %972 = vmatprep.subr.mxu0 %v226_v8  ;;  %v905_v9 = vld [vmem:[%s1228_s5] ss:$0 sm:$0xff] }
   0x6   :  { %973 = vmatpush3.msra.mxu0 %v226_v8  ;;  %v393_v19 = vld [vmem:[%s1229_s8] sm:$0xff] }
   0x7   :  { %984 = vmatprep.subr.mxu0 %v393_v19  ;;  %v910_v20 = vld [vmem:[%s1230_s7] ss:$0 sm:$0xff] }
   0x8   :  { %v44_v31 = vld [vmem:[%s1231_s1] sm:$0xff] }
   0x9   :  { %vm562_vm7 = vcmp.gt.f32.partialorder %v44_v31, 0.0  ;;  %v673_v53 = vld [vmem:[%s1232_s9] sm:$0xff] }
  0xd7   :  { %v964_v4 = vpop.f32.mrb[0].mxu0 }
  0xd8   :  { %v126_v5 = vpop.f32.mrb[1].mxu0 }
  0xd9   :  { %v1015_v6 = vpack.c.bf16 %v964_v4, %v126_v5 }
  0xdb   :  { %1016 = vmatprep.subr.bf16.mxu1 %v1015_v6 }
  0xdc   :  { %1018 = vmatpush3.bf16.msra.mxu1 %v1015_v6 }
  0xdf   :  { %970 = vmatmul.mubr.msk.f32.vlgmr.msra.gmra.mrb[0].mxu1 %vm142_vm2, %v43_v7 }
  0xe0   :  { %981 = vmatprep.mubr.msk.f32.mxu1 %vm142_vm2, %v42_v3 }
 0x1b2   :  { %v971_v10 = vpop.f32.mrb[0].mxu1 }
 0x1b3   :  { %v221_v11 = vadd.f32 %v971_v10, %v905_v9  ;;  %v215_v12 = vpop.f32.mrb[1].mxu1 }
 0x1b4   :  { %v216_v13 = vadd.f32 %v905_v9, %v215_v12  ;;  %v756_v9 = vld [vmem:[%s1235_s2 + $0x8] sm:$0xff] }
 0x1b6   :  { %1045 = vtanh.f32 %v216_v13 }
 0x1b7   :  { %1047 = vtanh.f32 %v221_v11  ;;  %v755_v11 = vld [vmem:[%s1235_s2] sm:$0xff]  ;;  %s1071_s2 = smov 8  }
 0x1c0   :  { %v1046_v14 = vpop.eup %1045 }
 0x1c1   :  { %v1048_v15 = vpop.eup %1047  ;;  %974 = vmatprep.mubr.msk.f32.mxu0 %vm227_vm3, %v1046_v14 }
 0x1c2   :  { %975 = vmatmul.mubr.msk.f32.vlgmr.msra.gmra.mrb[2].mxu0 %vm227_vm3, %v1048_v15 }
 0x1c3   :  { %985 = vmatpush3.msra.mxu0 %v393_v19 }
 0x295   :  { %v976_v16 = vpop.f32.mrb[2].mxu0 }
 0x296   :  { %v300_v17 = vpop.f32.mrb[3].mxu0 }
 0x297   :  { %v1019_v18 = vpack.c.bf16 %v976_v16, %v300_v17  ;;  %v925_v16 = vld [vmem:[#allocation2] ss:$0 sm:$0xff] }
 0x299   :  { %1020 = vmatprep.subr.bf16.mxu1 %v1019_v18 }
 0x29a   :  { %1022 = vmatpush3.bf16.msra.mxu1 %v1019_v18 }
 0x29d   :  { %982 = vmatmul.mubr.msk.f32.vlgmr.msra.gmra.mrb[2].mxu1 %vm142_vm2, %v43_v7 }
 0x370   :  { %v983_v21 = vpop.f32.mrb[2].mxu1 }
 0x371   :  { %v388_v22 = vadd.f32 %v983_v21, %v910_v20  ;;  %v382_v23 = vpop.f32.mrb[3].mxu1 }
 0x372   :  { %v383_v24 = vadd.f32 %v910_v20, %v382_v23 }
 0x373   :  { %1049 = vtanh.f32 %v388_v22 }
 0x374   :  { %1051 = vtanh.f32 %v383_v24 }
 0x37d   :  { %v1050_v25 = vpop.eup %1049 }
 0x37e   :  { %v1052_v26 = vpop.eup %1051 }
 0x37f   :  { %986 = vmatprep.mubr.msk.f32.mxu0 %vm227_vm3, %v1052_v26  ;;  %993 = vmatprep.mubr.msk.f32.mxu1 %vm227_vm3, %v1052_v26  ;;  %v1029_v27 = vpack.c.bf16 %v1050_v25, %v1052_v26 }
 0x380   :  { %987 = vmatmul.mubr.msk.f32.vlgmr.msra.gmra.mrb[4].mxu0 %vm227_vm3, %v1050_v25 }
 0x381   :  { %1030 = vmatprep.subr.bf16.mxu0 %v1029_v27 }
 0x382   :  { %1032 = vmatpush3.bf16.msra.mxu0 %v1029_v27 }
 0x383   :  { %1003 = vmatprep.subr.mxu0 %v673_v53 }
 0x453   :  { %v988_v28 = vpop.f32.mrb[4].mxu0 }
 0x454   :  { %v466_v29 = vpop.f32.mrb[5].mxu0 }
 0x455   :  { %v1023_v30 = vpack.c.bf16 %v988_v28, %v466_v29 }
 0x457   :  { %1025 = vmatprep.subr.msk.bf16.mxu1 %vm1024_vm4, %v1023_v30 }
 0x458   :  { %1028 = vmatpush3.bf16.xpose.msk.msra.mxu1 %vm1024_vm4, %v1023_v30 }
 0x45f   :  { %994 = vmatmul.mubr.msk.f32.vlgmr.msra.gmra.mrb[4].mxu1 %vm227_vm3, %v1050_v25 }
 0x460   :  { %1012 = vmatprep.mubr.msk.f32.mxu1 %vm142_vm2, %v44_v31 }
 0x532   :  { %v995_v32 = vpop.f32.mrb[4].mxu1 }
 0x533   :  { %vm557_vm5 = vcmp.gt.f32.partialorder %v995_v32, 0.0  ;;  %v559_v33 = vmul.f32 0.2, %v995_v32  ;;  %v547_v34 = vpop.f32.mrb[5].mxu1 }
 0x534   :  { %vm556_vm6 = vcmp.gt.f32.partialorder %v547_v34, 0.0  ;;  %v558_v36 = vmul.f32 0.2, %v547_v34 }
 0x535   :  { %v561_v38 = vsel %vm557_vm5, %v995_v32, %v559_v33 }
 0x536   :  { %v560_v37 = vsel %vm556_vm6, %v547_v34, %v558_v36  ;;  %v565_v41 = vsel %vm563_vm8, %v561_v38, -1e+30 }
 0x537   :  { %v564_v39 = vsel %vm562_vm7, %v560_v37, -1e+30  ;;  %v569_v42 = vsel %vm142_vm2, %v565_v41, -inf }
 0x538   :  { %v566_v40 = vsel %vm142_vm2, %v564_v39, -inf }
 0x539   :  { %567 = vmax.xlane.f32.xlu0 %v566_v40 }
 0x53d   :  { %570 = vmax.xlane.f32.xlu0 %v569_v42 }
 0x5c6   :  { %v568_v43 = vpop.xlane.xlu0 %567 }
 0x5c7   :  { %v572_v44 = vsub.f32 %v564_v39, %v568_v43 }
 0x5c9   :  { %v574_v45 = vmul.f32 1.442695, %v572_v44 }
 0x5ca   :  { %v571_v46 = vpop.xlane.xlu0 %570 }
 0x5cb   :  { %1053 = vpow2.f32 %v574_v45  ;;  %v573_v47 = vsub.f32 %v565_v41, %v571_v46 }
 0x5cd   :  { %v576_v48 = vmul.f32 1.442695, %v573_v47 }
 0x5cf   :  { %1055 = vpow2.f32 %v576_v48 }
 0x5d5   :  { %v1054_v49 = vpop.eup %1053 }
 0x5d6   :  { %v578_v50 = vsel %vm142_vm2, %v1054_v49, 0.0 }
 0x5d7   :  { %579 = vadd.xlane.f32.xlu1 %v578_v50 }
 0x5d9   :  { %v1056_v51 = vpop.eup %1055 }
 0x5da   :  { %v581_v52 = vsel %vm142_vm2, %v1056_v51, 0.0 }
 0x5db   :  { %582 = vadd.xlane.f32.xlu1 %v581_v52 }
 0x664   :  { %v580_v54 = vpop.xlane.xlu1 %579 }
 0x665   :  { %v584_v55 = vadd.f32 1e-16, %v580_v54 }
 0x667   :  { %1057 = vrcp.f32 %v584_v55 }
 0x668   :  { %v583_v56 = vpop.xlane.xlu1 %582 }
 0x669   :  { %v585_v57 = vadd.f32 1e-16, %v583_v56 }
 0x66b   :  { %1059 = vrcp.f32 %v585_v57 }
 0x671   :  { %v1058_v58 = vpop.eup %1057 }
 0x672   :  { %v587_v59 = vmul.f32 %v1058_v58, %v1054_v49 }
 0x674   :  { %590 = vst.msk [vmem:[%s1233_s11] sm:$0xff] %vm142_vm2, %v587_v59  ;;  %1000 = vmatprep.mubr.msk.f32.mxu0 %vm142_vm2, %v587_v59 }
 0x675   :  { %v1060_v60 = vpop.eup %1059 }
 0x676   :  { %v589_v61 = vmul.f32 %v1060_v60, %v1056_v51 }
 0x678   :  { %591 = vst.msk [vmem:[%s1233_s11 + $0x8] sm:$0xff] %vm142_vm2, %v589_v61  ;;  %1001 = vmatmul.mubr.msk.f32.vlgmr.msra.gmra.mrb[6].mxu0 %vm142_vm2, %v589_v61  ;;  %s1070_s11 = smov 126  }
 0x679   :  { %1004 = vmatpush3.msra.mxu0 %v673_v53 }
 0x74b   :  { %v1002_v62 = vpop.f32.mrb[6].mxu0 }
 0x74c   :  { %v664_v63 = vpop.f32.mrb[7].mxu0 }
 0x74d   :  { %1005 = vmatprep.mubr.msk.f32.mxu0 %vm227_vm3, %v664_v63 }
 0x74e   :  { %1006 = vmatmul.mubr.msk.f32.vlgmr.msra.gmra.mrb[8].mxu0 %vm227_vm3, %v1002_v62 }
 0x821   :  { %v1007_v0 = vpop.f32.mrb[8].mxu0 }
 0x822   :  { %v746_v2 = vpop.f32.mrb[9].mxu0 }
 0x823   :  { %v1040_v3 = vpack.i.bf16 %v1007_v0, %v746_v2  ;;  %759 = vrot.lane.b32.xlu1 %v746_v2, %s1069_s24 }
 0x825   :  { %1041 = vrot.lane.b32.xlu0 %v1040_v3, %s1070_s11 }
 0x827   :  { %761 = vrot.lane.b32.xlu1 %v1007_v0, %s1069_s24 }
 0x895   :  { %v760_v8 = vpop.permute.xlu1 %759 }
 0x896   :  { %v765_v13 = vmul.f32 %v760_v8, %v755_v11 }
 0x897   :  { %v1042_v4 = vpop.permute.xlu0 %1041 }
 0x898   :  { %v1044_v5 = vunpack.i.h.bf16 %v1042_v4  ;;  %v1043_v6 = vunpack.i.l.bf16 %v1042_v4  ;;  %v767_v17 = vadd.f32 %v765_v13, %v746_v2 }
 0x899   :  { %v762_v10 = vpop.permute.xlu1 %761 }
 0x89a   :  { %v1033_v7 = vpack.c.bf16 %v1044_v5, %v1043_v6  ;;  %v766_v12 = vmul.f32 %v762_v10, %v756_v9 }
 0x89c   :  { %1034 = vmatprep.subr.bf16.mxu1 %v1033_v7  ;;  %v768_v14 = vadd.f32 %v1007_v0, %v766_v12 }
 0x89d   :  { %1036 = vmatpush3.bf16.msra.mxu1 %v1033_v7 }
 0x8a0   :  { %1013 = vmatmul.mubr.msk.f32.vlgmr.msra.gmra.mrb[6].mxu1 %vm142_vm2, %v1183_v35 }
 0x973   :  { %v1014_v15 = vpop.f32.mrb[6].mxu1 }
 0x974   :  { %v857_v18 = vsub.f32 %v768_v14, %v1014_v15  ;;  %v847_v19 = vpop.f32.mrb[7].mxu1 }
 0x975   :  { %v856_v20 = vsub.f32 %v767_v17, %v847_v19 }
 0x976   :  { %v866_v21 = vadd.f32 %v925_v16, %v857_v18 }
 0x977   :  { %v865_v22 = vadd.f32 %v925_v16, %v856_v20 }
 0x978   :  { %v927_v23 = vmul.f32 -1.442695, %v866_v21 }
 0x979   :  { %v926_v24 = vmul.f32 -1.442695, %v865_v22 }
 0x97a   :  { %1061 = vpow2.f32 %v927_v23 }
 0x97b   :  { %1063 = vpow2.f32 %v926_v24 }
 0x984   :  { %v1062_v25 = vpop.eup %1061 }
 0x985   :  { %v1064_v26 = vpop.eup %1063  ;;  %v874_v27 = vadd.f32 1.0, %v1062_v25 }
 0x986   :  { %v873_v28 = vadd.f32 1.0, %v1064_v26 }
 0x987   :  { %1065 = vrcp.f32 %v874_v27 }
 0x988   :  { %1067 = vrcp.f32 %v873_v28 }
 0x991   :  { %v1066_v29 = vpop.eup %1065 }
 0x992   :  { %v1068_v30 = vpop.eup %1067  ;;  %883 = vrot.lane.b32.xlu0 %v1066_v29, %s1071_s2 }
 0x993   :  { %881 = vrot.lane.b32.xlu1 %v1068_v30, %s1071_s2 }
 0xa04   :  { %v884_v31 = vpop.permute.xlu0 %883 }
 0xa05   :  { %v888_v32 = vsel %vm227_vm3, %v1002_v62, %v884_v31  ;;  %v882_v33 = vpop.permute.xlu1 %881 }
 0xa06   :  { %v891_v34 = vsel %vm889_vm9, %v888_v32, 0.0  ;;  %v887_v35 = vsel %vm227_vm3, %v664_v63, %v882_v33 }
 0xa07   :  { %893 = vst [vmem:[%s1236_s12 + $0x8] sm:$0xff] %v891_v34  ;;  %v890_v36 = vsel %vm889_vm9, %v887_v35, 0.0 }
 0xa08   :  { %892 = vst [vmem:[%s1236_s12] sm:$0xff] %v890_v36 }

</bundles_post_ra>
